<compile_context>
chip_gen: v6e
topology: v6e:2x2x1
jax: 0.10.0
libtpu: 0.0.40
codegen_flags: <defaults>
</compile_context>

<pallas_src>
import functools

import jax
import jax.numpy as jnp
from jax import lax
from jax.experimental import pallas as pl
from jax.experimental.pallas import tpu as pltpu

NEG_BIG = -1e30  # finite "minus infinity" (avoids 0 * inf = NaN in the gathers)


def _attention_pooling_kernel(x_ref, batch_ref, w_ref,
                              acc_ref, m_ref, l_ref,
                              *, n_nodes, tile_n, tiles_per_split, max_block):
    c = pl.program_id(0)          # node-stream split (parallel across cores)
    t = pl.program_id(1)          # node tile within the split (reduction)

    @pl.when(t == 0)
    def _init():
        m_ref[...] = jnp.full_like(m_ref, NEG_BIG)
        l_ref[...] = jnp.zeros_like(l_ref)
        acc_ref[...] = jnp.zeros_like(acc_ref)

    x = x_ref[...]                               # [tile_n, D], native dtype
    batch_row = batch_ref[...]                   # [1, tile_n] int32 (-1 = pad)
    w = w_ref[...]                               # [1, D], already x dtype

    g_pad = m_ref.shape[0]

    # ---- zero garbage tail rows of the (possibly partial) last block -------
    # node_embeds is NOT padded host-side; OOB rows of the last block hold
    # undefined values, so they are explicitly zeroed before touching the MXU.
    if n_nodes % tile_n != 0:
        blk = jnp.minimum(c * tiles_per_split + t, max_block)
        row0 = blk * tile_n
        row_idx = lax.broadcasted_iota(jnp.int32, (tile_n, 1), 0)
        x = jnp.where(row0 + row_idx < n_nodes, x, jnp.zeros_like(x))

    # ---- projection: scores directly as a lane-dense row [1, tile_n] -------
    # contract last dims of (w, x): native MXU "nt" form; bias dropped
    # (softmax shift invariance).
    scores_row = lax.dot_general(
        w, x, dimension_numbers=(((1,), (1,)), ((), ())),
        preferred_element_type=jnp.float32)                   # [1, tile_n] f32

    # ---- membership mask: [G,1] iota column broadcast vs [1,tile_n] row ----
    gid_col = lax.broadcasted_iota(jnp.int32, (g_pad, 1), 0)
    is_member = batch_row == gid_col                          # [G, tile_n] bool
    onehot = is_member.astype(jnp.float32)                    # reused 3x below

    # ---- online softmax; per-graph stats are [G, 1] columns -----------------
    masked = jnp.where(is_member, scores_row, NEG_BIG)        # [G, tile_n]
    m_prev = m_ref[...]                                       # [G, 1]
    m_new = jnp.maximum(m_prev, jnp.max(masked, axis=1, keepdims=True))

    # gather running max back to nodes; padded columns get 0 -> exp(0)=1 but
    # their onehot row is all-zero, so they never contribute.
    node_max = jnp.sum(onehot * m_new, axis=0, keepdims=True)  # [1, tile_n]
    e_row = jnp.exp(scores_row - node_max)                     # [1, tile_n]
    e_gn = onehot * e_row                                      # [G, tile_n]

    alpha = jnp.exp(m_prev - m_new)                            # [G, 1], <= 1
    l_ref[...] = alpha * l_ref[...] + jnp.sum(e_gn, axis=1, keepdims=True)
    acc_ref[...] = alpha * acc_ref[...] + jnp.dot(
        e_gn.astype(x.dtype), x, preferred_element_type=jnp.float32)  # [G, D]
    m_ref[...] = m_new


def _round_up(x, m):
    return ((x + m - 1) // m) * m


def _choose_tile_n(n, d, g_pad, x_itemsize, requested):
    """Largest lane-aligned node tile fitting a generation-safe VMEM budget."""
    budget = 20 * 1024 * 1024          # conservative: fits v7x 32 MiB scoped
    cap = 2048 if requested is None else max(128, _round_up(requested, 128))
    best = 128
    for cand in (128, 256, 512, 1024, 2048):
        if cand > cap:
            break
        usage = (2 * cand * d * x_itemsize      # double-buffered x tile
                 + 2 * cand * 4                 # double-buffered batch row
                 + 2 * d * x_itemsize           # resident weight row
                 + g_pad * (d + 2) * 4          # resident acc / m / l blocks
                 + 6 * g_pad * cand * 4)        # mask / e_gn f32 temporaries
        if usage <= budget:
            best = cand
    return min(best, max(128, _round_up(max(n, 1), 128)))


def attention_pooling(node_embeds, batch, weight, bias, num_graphs, *,
                      tile_n=None, num_splits=2):
    """node_embeds: [N, D]; batch: [N] int; weight: [1, D] (nn.Linear); bias: [1].

    `bias` is accepted for API parity but unused: softmax is shift-invariant,
    so the scalar bias cancels exactly in the attention weights.
    """
    del bias
    n, d = node_embeds.shape
    out_dtype = node_embeds.dtype

    g_pad = max(8, _round_up(num_graphs, 8))           # sublane-aligned graphs
    tile_n = _choose_tile_n(n, d, g_pad, node_embeds.dtype.itemsize, tile_n)

    num_blocks = pl.cdiv(n, tile_n)                    # real node tiles
    num_splits = max(1, min(num_splits, num_blocks))   # per-core node streams
    tiles_per_split = pl.cdiv(num_blocks, num_splits)
    n_pad = num_splits * tiles_per_split * tile_n
    max_block = num_blocks - 1

    # Only the tiny int32 batch vector is padded host-side (-1 = no graph);
    # node_embeds is streamed as-is (ragged tail masked in-kernel).
    batch_p = jnp.pad(batch.reshape(-1).astype(jnp.int32), (0, n_pad - n),
                      constant_values=-1).reshape(1, n_pad)
    w_row = weight.reshape(1, d).astype(node_embeds.dtype)

    kernel = functools.partial(
        _attention_pooling_kernel, n_nodes=n, tile_n=tile_n,
        tiles_per_split=tiles_per_split, max_block=max_block)

    def x_map(c, t):
        # clamp so duplicated / out-of-range tiles re-read the last real block
        # (their batch columns are -1 so they contribute nothing).
        return (jnp.minimum(c * tiles_per_split + t, max_block), 0)

    acc, m, l = pl.pallas_call(
        kernel,
        out_shape=(
            jax.ShapeDtypeStruct((num_splits, g_pad, d), jnp.float32),  # acc
            jax.ShapeDtypeStruct((num_splits, g_pad, 1), jnp.float32),  # m
            jax.ShapeDtypeStruct((num_splits, g_pad, 1), jnp.float32),  # l
        ),
        grid=(num_splits, tiles_per_split),
        in_specs=[
            pl.BlockSpec((tile_n, d), x_map),                              # nodes
            pl.BlockSpec((1, tile_n), lambda c, t: (0, c * tiles_per_split + t)),
            pl.BlockSpec((1, d), lambda c, t: (0, 0)),                     # weight
        ],
        out_specs=(
            pl.BlockSpec((None, g_pad, d), lambda c, t: (c, 0, 0)),  # resident acc
            pl.BlockSpec((None, g_pad, 1), lambda c, t: (c, 0, 0)),  # resident max
            pl.BlockSpec((None, g_pad, 1), lambda c, t: (c, 0, 0)),  # resident sum
        ),
        compiler_params=pltpu.CompilerParams(
            dimension_semantics=("parallel", "arbitrary"),
            vmem_limit_bytes=48 * 1024 * 1024),
    )(node_embeds, batch_p, w_row)

    # Flash-style combine of the per-split partials (touches num_splits*G*D).
    m_tot = jnp.max(m, axis=0)                         # [g_pad, 1]
    scale = jnp.exp(m - m_tot)                         # [num_splits, g_pad, 1]
    l_tot = jnp.sum(scale * l, axis=0)                 # [g_pad, 1]
    acc_tot = jnp.sum(scale * acc, axis=0)             # [g_pad, D]
    out = (acc_tot / (l_tot + 1e-9)).astype(out_dtype)
    return out[:num_graphs]


def attention_pooling_ref(node_embeds, batch, weight, bias, num_graphs):
    """Pure-JAX reference matching the PyTorch forward (bias included)."""
    scores = node_embeds @ weight.reshape(-1) + bias[0]              # [N]
    seg_max = jax.ops.segment_max(scores, batch, num_segments=num_graphs)
    scores = jnp.exp(scores - seg_max[batch])
    seg_sum = jax.ops.segment_sum(scores, batch, num_segments=num_graphs)
    attn = scores / (seg_sum[batch] + 1e-9)
    return jax.ops.segment_sum(node_embeds * attn[:, None], batch,
                               num_segments=num_graphs)


if __name__ == "__main__":
    key = jax.random.PRNGKey(0)
    k_x, k_w, k_b, k_batch = jax.random.split(key, 4)

    num_nodes = 16
    hidden_dim = 32
    num_graphs = 2

    node_embeds = jax.random.normal(k_x, (num_nodes, hidden_dim), jnp.float32)
    # nn.Linear(hidden_dim, 1): weight [1, hidden_dim], bias [1]
    weight = jax.random.normal(k_w, (1, hidden_dim), jnp.float32) * 0.1
    bias = jax.random.normal(k_b, (1,), jnp.float32) * 0.1
    # graph assignment per node (both graphs non-empty)
    batch = jnp.sort(jax.random.randint(k_batch, (num_nodes,), 0, num_graphs))
    batch = batch.at[0].set(0).at[-1].set(num_graphs - 1)

    out = attention_pooling(node_embeds, batch, weight, bias, num_graphs)
    out = jax.block_until_ready(out)

    ref = attention_pooling_ref(node_embeds, batch, weight, bias, num_graphs)
    assert out.shape == (num_graphs, hidden_dim)
    assert jnp.allclose(out, ref, atol=1e-5, rtol=1e-5), (out, ref)

    print("KERNEL_OK")
</pallas_src>

<mosaic_0001>
module attributes {stable_mosaic.version = 11 : i64} {
  func.func @_attention_pooling_kernel(%arg0: i32, %arg1: i32, %arg2: memref<128x32xf32, #tpu.memory_space<vmem>>, %arg3: memref<1x128xi32, #tpu.memory_space<vmem>>, %arg4: memref<1x32xf32, #tpu.memory_space<vmem>>, %arg5: memref<1x8x32xf32, #tpu.memory_space<vmem>>, %arg6: memref<1x8x1xf32, #tpu.memory_space<vmem>>, %arg7: memref<1x8x1xf32, #tpu.memory_space<vmem>>) attributes {dimension_semantics = [#tpu.dimension_semantics<parallel>, #tpu.dimension_semantics<arbitrary>], iteration_bounds = array<i64: 1, 1>, scalar_prefetch = 0 : i64, scratch_operands = 0 : i64, tpu.core_type = #tpu.core_type<tc>, window_params = [{transform_indices = @transform_0, window_bounds = array<i64: 128, 32>}, {transform_indices = @transform_1, window_bounds = array<i64: 1, 128>}, {pipeline_mode = #tpu.pipeline_mode<synchronous>, transform_indices = @transform_2, window_bounds = array<i64: 1, 32>}, {transform_indices = @transform_3, window_bounds = array<i64: 1, 8, 32>}, {transform_indices = @transform_4, window_bounds = array<i64: 1, 8, 1>}, {transform_indices = @transform_5, window_bounds = array<i64: 1, 8, 1>}]} {
    %c0_i32 = arith.constant 0 : i32
    %0 = arith.cmpi eq, %arg1, %c0_i32 : i32
    %1 = arith.extui %0 : i1 to i32
    %c0_i32_0 = arith.constant 0 : i32
    %2 = arith.cmpi ne, %1, %c0_i32_0 : i32
    scf.if %2 {
      %cst_31 = arith.constant -1.000000e+30 : f32
      %66 = vector.broadcast %cst_31 : f32 to vector<8x1xf32>
      %c0_32 = arith.constant 0 : index
      %c0_33 = arith.constant 0 : index
      %c0_34 = arith.constant 0 : index
      %67 = vector.load %arg6[%c0_32, %c0_33, %c0_34] : memref<1x8x1xf32, #tpu.memory_space<vmem>>, vector<1x8x1xf32>
      %68 = vector.shape_cast %67 : vector<1x8x1xf32> to vector<8x1xf32>
      %69 = vector.shape_cast %66 : vector<8x1xf32> to vector<1x8x1xf32>
      tpu.vector_store %arg6[%c0_32, %c0_33, %c0_34], %69 {strides = array<i32>} : memref<1x8x1xf32, #tpu.memory_space<vmem>>, vector<1x8x1xf32>,
      %cst_35 = arith.constant 0.000000e+00 : f32
      %70 = vector.broadcast %cst_35 : f32 to vector<8x1xf32>
      %c0_36 = arith.constant 0 : index
      %c0_37 = arith.constant 0 : index
      %c0_38 = arith.constant 0 : index
      %71 = vector.load %arg7[%c0_36, %c0_37, %c0_38] : memref<1x8x1xf32, #tpu.memory_space<vmem>>, vector<1x8x1xf32>
      %72 = vector.shape_cast %71 : vector<1x8x1xf32> to vector<8x1xf32>
      %73 = vector.shape_cast %70 : vector<8x1xf32> to vector<1x8x1xf32>
      tpu.vector_store %arg7[%c0_36, %c0_37, %c0_38], %73 {strides = array<i32>} : memref<1x8x1xf32, #tpu.memory_space<vmem>>, vector<1x8x1xf32>,
      %cst_39 = arith.constant 0.000000e+00 : f32
      %74 = vector.broadcast %cst_39 : f32 to vector<8x32xf32>
      %c0_40 = arith.constant 0 : index
      %c0_41 = arith.constant 0 : index
      %c0_42 = arith.constant 0 : index
      %75 = vector.load %arg5[%c0_40, %c0_41, %c0_42] : memref<1x8x32xf32, #tpu.memory_space<vmem>>, vector<1x8x32xf32>
      %76 = vector.shape_cast %75 : vector<1x8x32xf32> to vector<8x32xf32>
      %77 = vector.shape_cast %74 : vector<8x32xf32> to vector<1x8x32xf32>
      tpu.vector_store %arg5[%c0_40, %c0_41, %c0_42], %77 {strides = array<i32>} : memref<1x8x32xf32, #tpu.memory_space<vmem>>, vector<1x8x32xf32>,
    } else {
    }
    %c0 = arith.constant 0 : index
    %c0_1 = arith.constant 0 : index
    %3 = vector.load %arg2[%c0, %c0_1] : memref<128x32xf32, #tpu.memory_space<vmem>>, vector<128x32xf32>
    %c0_2 = arith.constant 0 : index
    %c0_3 = arith.constant 0 : index
    %4 = vector.load %arg3[%c0_2, %c0_3] : memref<1x128xi32, #tpu.memory_space<vmem>>, vector<1x128xi32>
    %c0_4 = arith.constant 0 : index
    %c0_5 = arith.constant 0 : index
    %5 = vector.load %arg4[%c0_4, %c0_5] : memref<1x32xf32, #tpu.memory_space<vmem>>, vector<1x32xf32>
    %c1_i32 = arith.constant 1 : i32
    %6 = arith.muli %arg0, %c1_i32 : i32
    %7 = arith.addi %6, %arg1 : i32
    %c0_i32_6 = arith.constant 0 : i32
    %8 = arith.minsi %7, %c0_i32_6 : i32
    %c128_i32 = arith.constant 128 : i32
    %9 = arith.muli %8, %c128_i32 : i32
    %10 = tpu.iota {dimensions = array<i32: 0>} : vector<128x1xi32>
    %11 = vector.broadcast %9 : i32 to vector<128x1xi32>
    %12 = arith.addi %11, %10 : vector<128x1xi32>
    %c16_i32 = arith.constant 16 : i32
    %13 = vector.broadcast %c16_i32 : i32 to vector<128x1xi32>
    %14 = arith.cmpi slt, %12, %13 : vector<128x1xi32>
    %cst = arith.constant 0.000000e+00 : f32
    %15 = vector.broadcast %cst : f32 to vector<128x32xf32>
    %16 = vector.shape_cast %14 : vector<128x1xi1> to vector<128x1xi1>
    %17 = vector.broadcast %16 : vector<128x1xi1> to vector<128x32xi1>
    %18 = arith.select %17, %3, %15 : vector<128x32xi1>, vector<128x32xf32>
    %cst_7 = arith.constant dense<0.000000e+00> : vector<1x128xf32>
    %19 = tpu.matmul %5, %18, %cst_7 {dimension_numbers = #tpu.dot_dimension_numbers<[1], [1], [0], [0], [0, 0, 1, 0], [], []>} : vector<1x32xf32>, vector<128x32xf32>, vector<1x128xf32> -> vector<1x128xf32>
    %20 = tpu.iota {dimensions = array<i32: 0>} : vector<8x1xi32>
    %21 = vector.broadcast %4 : vector<1x128xi32> to vector<8x128xi32>
    %22 = vector.broadcast %20 : vector<8x1xi32> to vector<8x128xi32>
    %23 = arith.cmpi eq, %21, %22 : vector<8x128xi32>
    %24 = arith.extui %23 : vector<8x128xi1> to vector<8x128xi32>
    %25 = arith.sitofp %24 : vector<8x128xi32> to vector<8x128xf32>
    %cst_8 = arith.constant -1.000000e+30 : f32
    %26 = vector.shape_cast %19 : vector<1x128xf32> to vector<1x128xf32>
    %27 = vector.broadcast %26 : vector<1x128xf32> to vector<8x128xf32>
    %28 = vector.broadcast %cst_8 : f32 to vector<8x128xf32>
    %29 = arith.select %23, %27, %28 : vector<8x128xi1>, vector<8x128xf32>
    %c0_9 = arith.constant 0 : index
    %c0_10 = arith.constant 0 : index
    %c0_11 = arith.constant 0 : index
    %30 = vector.load %arg6[%c0_9, %c0_10, %c0_11] : memref<1x8x1xf32, #tpu.memory_space<vmem>>, vector<1x8x1xf32>
    %31 = vector.shape_cast %30 : vector<1x8x1xf32> to vector<8x1xf32>
    %cst_12 = arith.constant dense<0xFF800000> : vector<8xf32>
    %32 = vector.multi_reduction <maximumf>, %29, %cst_12 [1] : vector<8x128xf32> to vector<8xf32>
    %33 = vector.shape_cast %32 : vector<8xf32> to vector<8x1xf32>
    %34 = arith.maximumf %31, %33 : vector<8x1xf32>
    %35 = vector.broadcast %34 : vector<8x1xf32> to vector<8x128xf32>
    %36 = arith.mulf %25, %35 : vector<8x128xf32>
    %cst_13 = arith.constant dense<0.000000e+00> : vector<128xf32>
    %37 = vector.multi_reduction <add>, %36, %cst_13 [0] : vector<8x128xf32> to vector<128xf32>
    %38 = vector.shape_cast %37 : vector<128xf32> to vector<1x128xf32>
    %39 = arith.subf %19, %38 : vector<1x128xf32>
    %40 = math.exp %39 : vector<1x128xf32>
    %41 = vector.broadcast %40 : vector<1x128xf32> to vector<8x128xf32>
    %42 = arith.mulf %25, %41 : vector<8x128xf32>
    %43 = arith.subf %31, %34 : vector<8x1xf32>
    %44 = math.exp %43 : vector<8x1xf32>
    %c0_14 = arith.constant 0 : index
    %c0_15 = arith.constant 0 : index
    %c0_16 = arith.constant 0 : index
    %45 = vector.load %arg7[%c0_14, %c0_15, %c0_16] : memref<1x8x1xf32, #tpu.memory_space<vmem>>, vector<1x8x1xf32>
    %46 = vector.shape_cast %45 : vector<1x8x1xf32> to vector<8x1xf32>
    %47 = arith.mulf %44, %46 : vector<8x1xf32>
    %cst_17 = arith.constant dense<0.000000e+00> : vector<8xf32>
    %48 = vector.multi_reduction <add>, %42, %cst_17 [1] : vector<8x128xf32> to vector<8xf32>
    %49 = vector.shape_cast %48 : vector<8xf32> to vector<8x1xf32>
    %50 = arith.addf %47, %49 : vector<8x1xf32>
    %c0_18 = arith.constant 0 : index
    %c0_19 = arith.constant 0 : index
    %c0_20 = arith.constant 0 : index
    %51 = vector.load %arg7[%c0_18, %c0_19, %c0_20] : memref<1x8x1xf32, #tpu.memory_space<vmem>>, vector<1x8x1xf32>
    %52 = vector.shape_cast %51 : vector<1x8x1xf32> to vector<8x1xf32>
    %53 = vector.shape_cast %50 : vector<8x1xf32> to vector<1x8x1xf32>
    tpu.vector_store %arg7[%c0_18, %c0_19, %c0_20], %53 {strides = array<i32>} : memref<1x8x1xf32, #tpu.memory_space<vmem>>, vector<1x8x1xf32>,
    %c0_21 = arith.constant 0 : index
    %c0_22 = arith.constant 0 : index
    %c0_23 = arith.constant 0 : index
    %54 = vector.load %arg5[%c0_21, %c0_22, %c0_23] : memref<1x8x32xf32, #tpu.memory_space<vmem>>, vector<1x8x32xf32>
    %55 = vector.shape_cast %54 : vector<1x8x32xf32> to vector<8x32xf32>
    %56 = vector.broadcast %44 : vector<8x1xf32> to vector<8x32xf32>
    %57 = arith.mulf %56, %55 : vector<8x32xf32>
    %cst_24 = arith.constant dense<0.000000e+00> : vector<8x32xf32>
    %58 = tpu.matmul %42, %18, %cst_24 {dimension_numbers = #tpu.dot_dimension_numbers<[1], [0], [0], [1], [0, 0, 1, 1], [], []>} : vector<8x128xf32>, vector<128x32xf32>, vector<8x32xf32> -> vector<8x32xf32>
    %59 = arith.addf %57, %58 : vector<8x32xf32>
    %c0_25 = arith.constant 0 : index
    %c0_26 = arith.constant 0 : index
    %c0_27 = arith.constant 0 : index
    %60 = vector.load %arg5[%c0_25, %c0_26, %c0_27] : memref<1x8x32xf32, #tpu.memory_space<vmem>>, vector<1x8x32xf32>
    %61 = vector.shape_cast %60 : vector<1x8x32xf32> to vector<8x32xf32>
    %62 = vector.shape_cast %59 : vector<8x32xf32> to vector<1x8x32xf32>
    tpu.vector_store %arg5[%c0_25, %c0_26, %c0_27], %62 {strides = array<i32>} : memref<1x8x32xf32, #tpu.memory_space<vmem>>, vector<1x8x32xf32>,
    %c0_28 = arith.constant 0 : index
    %c0_29 = arith.constant 0 : index
    %c0_30 = arith.constant 0 : index
    %63 = vector.load %arg6[%c0_28, %c0_29, %c0_30] : memref<1x8x1xf32, #tpu.memory_space<vmem>>, vector<1x8x1xf32>
    %64 = vector.shape_cast %63 : vector<1x8x1xf32> to vector<8x1xf32>
    %65 = vector.shape_cast %34 : vector<8x1xf32> to vector<1x8x1xf32>
    tpu.vector_store %arg6[%c0_28, %c0_29, %c0_30], %65 {strides = array<i32>} : memref<1x8x1xf32, #tpu.memory_space<vmem>>, vector<1x8x1xf32>,
    return
  }
  func.func @transform_0(%arg0: i32, %arg1: i32) -> (i32, i32) {
    %c1_i32 = arith.constant 1 : i32
    %0 = arith.muli %arg0, %c1_i32 : i32
    %1 = arith.addi %0, %arg1 : i32
    %c0_i32 = arith.constant 0 : i32
    %2 = arith.minsi %1, %c0_i32 : i32
    %c0_i32_0 = arith.constant 0 : i32
    %c0_i32_1 = arith.constant 0 : i32
    return %2, %c0_i32_0 : i32, i32
  }
  func.func @transform_1(%arg0: i32, %arg1: i32) -> (i32, i32) {
    %c1_i32 = arith.constant 1 : i32
    %0 = arith.muli %arg0, %c1_i32 : i32
    %1 = arith.addi %0, %arg1 : i32
    %c0_i32 = arith.constant 0 : i32
    %c0_i32_0 = arith.constant 0 : i32
    return %c0_i32, %1 : i32, i32
  }
  func.func @transform_2(%arg0: i32, %arg1: i32) -> (i32, i32) {
    %c0_i32 = arith.constant 0 : i32
    %c0_i32_0 = arith.constant 0 : i32
    %c0_i32_1 = arith.constant 0 : i32
    return %c0_i32, %c0_i32_0 : i32, i32
  }
  func.func @transform_3(%arg0: i32, %arg1: i32) -> (i32, i32, i32) {
    %c0_i32 = arith.constant 0 : i32
    %c0_i32_0 = arith.constant 0 : i32
    %c0_i32_1 = arith.constant 0 : i32
    return %arg0, %c0_i32, %c0_i32_0 : i32, i32, i32
  }
  func.func @transform_4(%arg0: i32, %arg1: i32) -> (i32, i32, i32) {
    %c0_i32 = arith.constant 0 : i32
    %c0_i32_0 = arith.constant 0 : i32
    %c0_i32_1 = arith.constant 0 : i32
    return %arg0, %c0_i32, %c0_i32_0 : i32, i32, i32
  }
  func.func @transform_5(%arg0: i32, %arg1: i32) -> (i32, i32, i32) {
    %c0_i32 = arith.constant 0 : i32
    %c0_i32_0 = arith.constant 0 : i32
    %c0_i32_1 = arith.constant 0 : i32
    return %arg0, %c0_i32, %c0_i32_0 : i32, i32, i32
  }
}

</mosaic_0001>

<bundles_post_ra>
// kernel: tpu_custom_call.1
= control target key start
LH: loop header
LB: loop body
LE: loop exit
PB: predicated region body
PF: predicated region fallthrough
CT: control target
= control target key end

     0   :  { %11 = vsyncpa [#allocation3], 0  ;;  %s627_s0 = inlined_call_operand.hbm [shape: f32[16,32], index: 0, kind: input, shape index: {}]   ;;  %s628_s1 = inlined_call_operand.vmem [shape: s32[1,128], index: 1, kind: input, shape index: {}]   ;;  %s629_s2 = inlined_call_operand.vmem [shape: f32[1,32], index: 2, kind: input, shape index: {}]   ;;  %s630_s3 = inlined_call_operand.hbm [shape: f32[1,8,32], index: 3, kind: output, shape index: {0}]   ;;  %s631_s4 = inlined_call_operand.vmem [shape: f32[1,8,1], index: 4, kind: output, shape index: {1}]   ;;  %s632_s5 = inlined_call_operand.vmem [shape: f32[1,8,1], index: 5, kind: output, shape index: {2}]  }
   0x1   :  { %12 = vsyncpa [#allocation4], 0 }
   0x2   :  { %23 = vsyncadd [#allocation3], 1792  ;;  %s550_s18 = smov [#allocation2]  }
   0x3   :  { %s28_s19 = sshll.u32 %s550_s18, 4  ;;  %s29_s19 = int_to_ptr.vmem [resolvable:$true] %s28_s19 }
   0x4   :  { %s514_s20 = scalar_lea.vmem %s29_s19, 256  ;;  %s518_s21 = scalar_lea.vmem %s29_s19, 2048 }
   0x5   :  { %p515_p0 = scmp.ne.s32.totalorder %s29_s19, %s514_s20  ;;  %p519_p1 = scmp.lt.s32.totalorder %s29_s19, %s29_s19 }
   0x6   :  { %p520_p2 = scmp.lt.s32.totalorder %s518_s21, %s514_s20 }
   0x8   :  { %p521_p3 = por %p520_p2, %p519_p1 }
   0xa   :  { %p522_p4 = pnand %p521_p3, %p515_p0 }
   0xc   :  { %525 = shalt.err (!%p522_p4)
}
   0xd   :  { %s551_s22 = smov 128   ;;  %s552_s23 = smov 8  }
   0xe   :  { %34 = dma.hbm_to_vmem [thread:$0]  %s627_s0, 256, %s29_s19, [#allocation3], %s551_s22, %s551_s22, %s552_s23  }
   0xf   :  { %546 = dma.done.wait [#allocation3], 2048  }
  0x10   :  { %547 = vsyncadd [#allocation3], 4294965248  ;;  %vm69_vm0 = vcmask 261120   ;;  %v553_v0 = vmov 0.0   ;;  %vm554_vm1 = vmmov 0   ;;  %v72_v1 = vld [vmem:[#allocation2 + $0x8] sm:$0xff]  ;;  %v93_v5 = vlaneseq }
  0x11   :  { %478 = vmatprep.subr.mxu0 %v553_v0  ;;  %70 = vst.msk [vmem:[#allocation5] sm:$0xff] %vm69_vm0, %v553_v0  ;;  %482 = vmatprep.mubr.msk.f32.mxu0 %vm554_vm1, %v553_v0  ;;  %v71_v2 = vld [vmem:[#allocation2] sm:$0xff]  ;;  %vm66_vm2 = vcmask 7168   ;;  %v555_v4 = vmov -1e+30   ;;  %v556_v13 = vmov 0  }
  0x12   :  { %485 = vmatprep.subr.mxu1 %v553_v0  ;;  %489 = vmatprep.mubr.msk.f32.mxu1 %vm554_vm1, %v553_v0  ;;  %v88_v3 = vld [vmem:[%s629_s2] sm:$0x1]  ;;  %67 = vst.msk [vmem:[%s631_s4] sm:$0xff] %vm66_vm2, %v555_v4  ;;  %68 = vst.msk [vmem:[%s632_s5] sm:$0xff] %vm66_vm2, %v553_v0  ;;  %v94_v6 = vshrl.u32 %v93_v5, 7  ;;  %s557_s13 = smov [#allocation5]  }
  0x13   :  { %479 = vmatpush3.xpose.msk.msra.mxu0 %vm69_vm0, %v72_v1  ;;  %486 = vmatpush3.msra.mxu1 %v72_v1  ;;  %v470_v7 = vld [vmem:[%s628_s1] ss:$0 sm:$0xff]  ;;  %s445_s14 = sshll.u32 %s557_s13, 4  ;;  %s446_s14 = int_to_ptr.vmem [resolvable:$true] %s445_s14 }
  0x14   :  { %480 = vmatprep.subr.mxu0 %v553_v0  ;;  %487 = vmatprep.subr.mxu1 %v553_v0  ;;  %v322_v8 = vsub.s32 0, %v94_v6  ;;  %vm317_vm3 = vcmp.eq.s32.totalorder %v470_v7, %v94_v6  ;;  %s526_s15 = scalar_lea.vmem %s446_s14, 128  ;;  %p531_p6 = scmp.lt.s32.totalorder %s446_s14, %s446_s14 }
  0x15   :  { %488 = vmatpush3.msra.mxu1 %v71_v2  ;;  %500 = vset.pattern.permute.xlu0 %v556_v13  ;;  %v471_v18 = vsel %vm317_vm3, 1.0, %v553_v0  ;;  %p527_p5 = scmp.ne.s32.totalorder %s446_s14, %s526_s15  ;;  %p532_p7 = scmp.lt.s32.totalorder %s526_s15, %s526_s15 }
  0x16   :  { %501 = vset.pattern.permute.xlu1 %v556_v13 }
  0x17   :  { %481 = vmatpush3.xpose.msk.msra.mxu0 %vm69_vm0, %v71_v2  ;;  %p533_p8 = por %p532_p7, %p531_p6 }
  0x18   :  { %v359_v38 = vld [vmem:[#allocation5] sm:$0xff] }
  0x19   :  { %v325_v14 = vld [vmem:[%s631_s4] sm:$0xff]  ;;  %p534_p9 = pnand %p533_p8, %p527_p5 }
  0x1a   :  { %483 = vmatmul.mubr.msk.f32.vlgmr.msra.gmra.mxu0 %vm69_vm0, %v88_v3  ;;  %v352_v34 = vld [vmem:[%s632_s5] sm:$0xff] }
  0xda   :  { %v309_v9 = vpop.f32.mrf.mxu0 }
  0xdb   :  { %v323_v10 = vrot.slane %v309_v9, %v322_v8 }
  0xdc   :  { %v484_v11 = vpop.f32.mrf.mxu0 }
  0xdd   :  { %v324_v12 = vsel %vm317_vm3, %v323_v10, -1e+30 }
  0xde   :  { %326 = vmax.xlane.f32.xlu0 %v324_v12 }
 0x167   :  { %v327_v15 = vpop.xlane.xlu0 %326 }
 0x168   :  { %v328_v16 = vmax.f32 %v325_v14, %v327_v15 }
 0x16a   :  { %v349_v17 = vsub.f32 %v325_v14, %v328_v16  ;;  %438 = vst.msk [vmem:[%s631_s4] sm:$0xff] %vm66_vm2, %v328_v16  ;;  %331 = vperm.xlu0 %500, %v328_v16  }
 0x16c   :  { %v350_v32 = vmul.f32 1.442695, %v349_v17 }
 0x1e5   :  { %v332_v19 = vpop.permute.xlu0 %331 }
 0x1e6   :  { %v334_v20 = vmul.f32 %v471_v18, %v332_v19 }
 0x1e8   :  { %v335_v21 = vrot.slane %v334_v20, 4 }
 0x1ea   :  { %v336_v22 = vadd.f32 %v335_v21, %v334_v20 }
 0x1ec   :  { %v337_v23 = vrot.slane %v336_v22, 2 }
 0x1ee   :  { %v338_v24 = vadd.f32 %v337_v23, %v336_v22 }
 0x1f0   :  { %v339_v25 = vrot.slane %v338_v24, 1 }
 0x1f2   :  { %v340_v26 = vadd.f32 %v339_v25, %v338_v24 }
 0x1f4   :  { %v341_v27 = vsub.f32 %v309_v9, %v340_v26 }
 0x1f6   :  { %v342_v28 = vmul.f32 1.442695, %v341_v27 }
 0x1f8   :  { %502 = vpow2.f32 %v342_v28 }
 0x1f9   :  { %504 = vpow2.f32 %v350_v32 }
 0x205   :  { %v503_v29 = vpop.eup %502 }
 0x206   :  { %v347_v30 = vrot.slane %v503_v29, %v322_v8  ;;  %v505_v33 = vpop.eup %504 }
 0x207   :  { %v353_v35 = vmul.f32 %v505_v33, %v352_v34 }
 0x208   :  { %v348_v31 = vmul.f32 %v471_v18, %v347_v30 }
 0x20a   :  { %354 = vadd.xlane.f32.xlu1 %v348_v31  ;;  %490 = vmatmul.mubr.f32.vlgmr.msra.gmra.mxu1 %v348_v31 }
 0x21b   :  { %362 = vperm.xlu1 %501, %v505_v33  }
 0x293   :  { %v355_v36 = vpop.xlane.xlu1 %354 }
 0x294   :  { %v356_v37 = vadd.f32 %v355_v36, %v353_v35 }
 0x296   :  { %358 = vst.msk [vmem:[%s632_s5] sm:$0xff] %vm66_vm2, %v356_v37 }
 0x297   :  { %v363_v39 = vpop.permute.xlu1 %362 }
 0x298   :  { %v365_v40 = vmul.f32 %v363_v39, %v359_v38 }
 0x2ca   :  { %v432_v41 = vpop.f32.mrf.mxu1 }
 0x2cb   :  { %v436_v42 = vadd.f32 %v432_v41, %v365_v40 }
 0x2cc   :  { %v491_v43 = vpop.f32.mrf.mxu1 }
 0x2cd   :  { %437 = vst.msk [vmem:[#allocation5] sm:$0xff] %vm69_vm0, %v436_v42 }
 0x2ce   :  { %537 = shalt.err (!%p534_p9)
}
 0x2cf   :  { %448 = dma.vmem_to_hbm [thread:$0]  %s446_s14, 128, %s630_s3, [#allocation4]  }
 0x2d0   :  { %548 = dma.done.wait [#allocation4], 128  }
 0x2d1   :  { %549 = vsyncadd [#allocation4], 4294967168 }
 0x2d2   :  { %460 = vsyncpa [#allocation3], 1 }
 0x2d3   :  { %461 = vsyncpa [#allocation4], 1 }

</bundles_post_ra>
